<compile_context>
chip_gen: v7x
topology: tpu7x:2x2x1
jax: 0.10.0
libtpu: 0.0.40
codegen_flags: <defaults>
</compile_context>

<pallas_src>
import math

import jax
import jax.numpy as jnp
import numpy as np
from jax.experimental import pallas as pl
from jax.experimental.pallas import tpu as pltpu

# ----------------------------- config ---------------------------------------
B = 2
FREQ_DIM = 16
SEM_DIM = 24
HIDDEN = 32
NUM_HEADS = 4
HEAD_DIM = HIDDEN // NUM_HEADS
SCALE = 1.0 / math.sqrt(HEAD_DIM)

MAX_BATCH_BLOCK = 4096   # rows per grid step once the op is actually batched
MIN_GRID_STEPS = 4       # keep >=4 steps at large batch so both v7x TCs get work
PALLAS_MIN_BATCH = 128   # below this, plain JAX (XLA fuses) beats a kernel launch
SUBLANE = 16             # row-tile granularity valid for both f32 (8) and bf16 (16)


def _round_up(x, m):
    return (x + m - 1) // m * m


# ----------------------------- kernel ---------------------------------------
def _fused_value_kernel(x_ref, w_ref, b_ref, out_ref):
    """out = x @ W_eff + b_eff  (exact forward of CrossAttentionFusion).

    x_ref : (tb, FREQ_DIM)   activations (f32 or bf16)
    w_ref : (FREQ_DIM, HIDDEN) folded weight (f32 or bf16), constant across grid
    b_ref : (1, HIDDEN)      folded bias, always f32
    The dot accumulates in f32; bias add and the single final cast happen on the
    f32 result (v5e-safe: no bf16 element-wise math).
    """
    acc = jnp.dot(x_ref[...], w_ref[...], preferred_element_type=jnp.float32)
    out_ref[...] = (acc + b_ref[...]).astype(out_ref.dtype)


# ----------------------------- wrapper ---------------------------------------
def _pick_block(bn):
    # >= MIN_GRID_STEPS steps for large batches (megacore sharding on v7x),
    # capped at MAX_BATCH_BLOCK, rows a multiple of the sublane tile.
    tb = _round_up(max(1, pl.cdiv(bn, MIN_GRID_STEPS)), SUBLANE)
    return max(SUBLANE, min(MAX_BATCH_BLOCK, tb))


def cross_attention_fusion(freq_feat, sem_feat, w_eff, b_eff, *, force_pallas=False):
    """Forward of CrossAttentionFusion.

    sem_feat is accepted for interface fidelity but exactly (not approximately)
    does not affect the output (length-1 key axis -> softmax == 1), so it is
    never DMA'd into the kernel.
    """
    del sem_feat
    bn, fd = freq_feat.shape
    out_dtype = freq_feat.dtype

    if not force_pallas and bn < PALLAS_MIN_BATCH:
        # Tiny batches: the work is ~100 ns of DMA+MXU; let XLA fuse the affine
        # into neighbouring ops instead of paying kernel dispatch overhead.
        acc = jnp.dot(freq_feat, w_eff.astype(out_dtype),
                      preferred_element_type=jnp.float32)
        return (acc + b_eff).astype(out_dtype)

    tb = _pick_block(bn)
    grid = pl.cdiv(bn, tb)   # partial last block handled by Pallas OOB semantics

    return pl.pallas_call(
        _fused_value_kernel,
        out_shape=jax.ShapeDtypeStruct((bn, HIDDEN), out_dtype),
        grid_spec=pltpu.PrefetchScalarGridSpec(
            num_scalar_prefetch=0,
            grid=(grid,),
            in_specs=[
                pl.BlockSpec((tb, fd), lambda i: (i, 0)),
                pl.BlockSpec((fd, HIDDEN), lambda i: (0, 0)),   # constant: DMA'd once
                pl.BlockSpec((1, HIDDEN), lambda i: (0, 0)),    # constant: DMA'd once
            ],
            out_specs=pl.BlockSpec((tb, HIDDEN), lambda i: (i, 0)),
        ),
        compiler_params=pltpu.CompilerParams(
            # Batch axis is embarrassingly parallel: sharded across the two
            # TensorCores on v7x, no effect on single-TC v5e/v6e.
            dimension_semantics=("parallel",),
        ),
    )(freq_feat, w_eff, b_eff)


# ----------------------------- param setup ------------------------------------
def make_params(key):
    ks = jax.random.split(key, 14)

    def lin(kw, kb, in_dim, out_dim):
        # weight already transposed: (in_dim, out_dim) so x @ W + b
        w = jax.random.normal(kw, (in_dim, out_dim), jnp.float32) * 0.05
        b = jax.random.normal(kb, (1, out_dim), jnp.float32) * 0.05
        return w, b

    wq, bq = lin(ks[0], ks[1], SEM_DIM, HIDDEN)      # query_proj
    wk, bk = lin(ks[2], ks[3], FREQ_DIM, HIDDEN)     # key_proj
    wv, bv = lin(ks[4], ks[5], FREQ_DIM, HIDDEN)     # value_proj
    wqi, bqi = lin(ks[6], ks[7], HIDDEN, HIDDEN)     # MHA in-proj (q slice)
    wki, bki = lin(ks[8], ks[9], HIDDEN, HIDDEN)     # MHA in-proj (k slice)
    wvi, bvi = lin(ks[10], ks[11], HIDDEN, HIDDEN)   # MHA in-proj (v slice)
    wo, bo = lin(ks[12], ks[13], HIDDEN, HIDDEN)     # MHA out-proj
    return (wq, bq, wk, bk, wv, bv, wqi, bqi, wki, bki, wvi, bvi, wo, bo)


def fold_value_path(params, weight_dtype=jnp.float32):
    """Host-side (one-time) fold of value_proj -> MHA v in-proj -> out-proj.

    Fold is always computed in f32; only the final weight is cast. The bias is
    kept f32 so the kernel adds it to the f32 accumulator.
    """
    (_wq, _bq, _wk, _bk, wv, bv, _wqi, _bqi, _wki, _bki, wvi, bvi, wo, bo) = params
    w_eff = wv @ wvi @ wo                       # (FREQ_DIM, HIDDEN), f32
    b_eff = (bv @ wvi + bvi) @ wo + bo          # (1, HIDDEN), f32
    return w_eff.astype(weight_dtype), b_eff.astype(jnp.float32)


# ----------------------------- pure-JAX reference -----------------------------
def reference(freq_feat, sem_feat, params):
    """Full, unsimplified forward (matches the PyTorch module exactly)."""
    (wq, bq, wk, bk, wv, bv, wqi, bqi, wki, bki, wvi, bvi, wo, bo) = params
    q0 = sem_feat @ wq + bq
    k0 = freq_feat @ wk + bk
    v0 = freq_feat @ wv + bv
    q1 = q0 @ wqi + bqi
    k1 = k0 @ wki + bki
    v1 = v0 @ wvi + bvi
    bn = q1.shape[0]
    qh = q1.reshape(bn, NUM_HEADS, HEAD_DIM)
    kh = k1.reshape(bn, NUM_HEADS, HEAD_DIM)
    vh = v1.reshape(bn, NUM_HEADS, HEAD_DIM)
    s = jnp.sum(qh * kh, axis=-1, keepdims=True) * SCALE   # (B, H, 1)
    w = jax.nn.softmax(s, axis=-1)                          # length-1 key axis -> 1
    attn = (w * vh).reshape(bn, HIDDEN)
    return attn @ wo + bo


# ----------------------------- main -------------------------------------------
if __name__ == "__main__":
    key = jax.random.PRNGKey(0)
    k_freq, k_sem, k_params, k_freq_big = jax.random.split(key, 4)

    params = make_params(k_params)
    w_eff_f32, b_eff = fold_value_path(params, jnp.float32)

    # --- spec config (B=2): exercise the Pallas path explicitly, f32, exact ---
    freq_feat = jax.random.normal(k_freq, (B, FREQ_DIM), jnp.float32)
    sem_feat = jax.random.normal(k_sem, (B, SEM_DIM), jnp.float32)

    out = jax.block_until_ready(
        cross_attention_fusion(freq_feat, sem_feat, w_eff_f32, b_eff, force_pallas=True))
    ref = jax.block_until_ready(reference(freq_feat, sem_feat, params))
    np.testing.assert_allclose(np.asarray(out), np.asarray(ref), rtol=1e-5, atol=2e-5)

    # Auto-dispatch (tiny batch -> fused plain-JAX affine) gives the same result.
    out_xla = jax.block_until_ready(
        cross_attention_fusion(freq_feat, sem_feat, w_eff_f32, b_eff))
    np.testing.assert_allclose(np.asarray(out_xla), np.asarray(ref), rtol=1e-5, atol=2e-5)

    # --- batched config: multi-step grid + partial (un-padded) last block ---
    BN = 300
    freq_big = jax.random.normal(k_freq_big, (BN, FREQ_DIM), jnp.float32)
    sem_big = jnp.zeros((BN, SEM_DIM), jnp.float32)   # provably irrelevant
    ref_big = jax.block_until_ready(reference(freq_big, sem_big, params))

    out_big = jax.block_until_ready(
        cross_attention_fusion(freq_big, sem_big, w_eff_f32, b_eff))
    np.testing.assert_allclose(np.asarray(out_big), np.asarray(ref_big),
                               rtol=1e-5, atol=2e-5)

    # --- bf16 weights + activations (v6e/v7x DMA-bound regime), f32 accumulate ---
    w_eff_bf16, b_eff_f32 = fold_value_path(params, jnp.bfloat16)
    out_big_bf16 = jax.block_until_ready(
        cross_attention_fusion(freq_big.astype(jnp.bfloat16), sem_big,
                               w_eff_bf16, b_eff_f32))
    np.testing.assert_allclose(np.asarray(out_big_bf16.astype(jnp.float32)),
                               np.asarray(ref_big), rtol=5e-2, atol=1e-2)

    print("KERNEL_OK")
</pallas_src>

<mosaic_0001>
module attributes {stable_mosaic.version = 11 : i64} {
  func.func @_fused_value_kernel(%arg0: i32, %arg1: memref<16x16xf32, #tpu.memory_space<vmem>>, %arg2: memref<16x32xf32, #tpu.memory_space<vmem>>, %arg3: memref<1x32xf32, #tpu.memory_space<vmem>>, %arg4: memref<16x32xf32, #tpu.memory_space<vmem>>) attributes {dimension_semantics = [#tpu.dimension_semantics<parallel>], iteration_bounds = array<i64: 1>, scalar_prefetch = 0 : i64, scratch_operands = 0 : i64, tpu.core_type = #tpu.core_type<tc>, window_params = [{transform_indices = @transform_0, window_bounds = array<i64: 16, 16>}, {pipeline_mode = #tpu.pipeline_mode<synchronous>, transform_indices = @transform_1, window_bounds = array<i64: 16, 32>}, {pipeline_mode = #tpu.pipeline_mode<synchronous>, transform_indices = @transform_2, window_bounds = array<i64: 1, 32>}, {transform_indices = @transform_3, window_bounds = array<i64: 16, 32>}]} {
    %c0 = arith.constant 0 : index
    %c0_0 = arith.constant 0 : index
    %0 = vector.load %arg1[%c0, %c0_0] : memref<16x16xf32, #tpu.memory_space<vmem>>, vector<16x16xf32>
    %c0_1 = arith.constant 0 : index
    %c0_2 = arith.constant 0 : index
    %1 = vector.load %arg2[%c0_1, %c0_2] : memref<16x32xf32, #tpu.memory_space<vmem>>, vector<16x32xf32>
    %cst = arith.constant dense<0.000000e+00> : vector<16x32xf32>
    %2 = tpu.matmul %0, %1, %cst {dimension_numbers = #tpu.dot_dimension_numbers<[1], [0], [0], [1], [0, 0, 1, 1], [], []>} : vector<16x16xf32>, vector<16x32xf32>, vector<16x32xf32> -> vector<16x32xf32>
    %c0_3 = arith.constant 0 : index
    %c0_4 = arith.constant 0 : index
    %3 = vector.load %arg3[%c0_3, %c0_4] : memref<1x32xf32, #tpu.memory_space<vmem>>, vector<1x32xf32>
    %4 = vector.broadcast %3 : vector<1x32xf32> to vector<16x32xf32>
    %5 = arith.addf %2, %4 : vector<16x32xf32>
    %c0_5 = arith.constant 0 : index
    %c0_6 = arith.constant 0 : index
    %6 = vector.load %arg4[%c0_5, %c0_6] : memref<16x32xf32, #tpu.memory_space<vmem>>, vector<16x32xf32>
    tpu.vector_store %arg4[%c0_5, %c0_6], %5 {strides = array<i32>} : memref<16x32xf32, #tpu.memory_space<vmem>>, vector<16x32xf32>,
    return
  }
  func.func @transform_0(%arg0: i32) -> (i32, i32) {
    %c0_i32 = arith.constant 0 : i32
    %c0_i32_0 = arith.constant 0 : i32
    return %arg0, %c0_i32 : i32, i32
  }
  func.func @transform_1(%arg0: i32) -> (i32, i32) {
    %c0_i32 = arith.constant 0 : i32
    %c0_i32_0 = arith.constant 0 : i32
    %c0_i32_1 = arith.constant 0 : i32
    return %c0_i32, %c0_i32_0 : i32, i32
  }
  func.func @transform_2(%arg0: i32) -> (i32, i32) {
    %c0_i32 = arith.constant 0 : i32
    %c0_i32_0 = arith.constant 0 : i32
    %c0_i32_1 = arith.constant 0 : i32
    return %c0_i32, %c0_i32_0 : i32, i32
  }
  func.func @transform_3(%arg0: i32) -> (i32, i32) {
    %c0_i32 = arith.constant 0 : i32
    %c0_i32_0 = arith.constant 0 : i32
    return %arg0, %c0_i32 : i32, i32
  }
}

</mosaic_0001>

<bundles_post_ra>
// kernel: tpu_custom_call.1
= control target key start
LH: loop header
LB: loop body
LE: loop exit
PB: predicated region body
PF: predicated region fallthrough
CT: control target
= control target key end

     0   :  { %8 = vsyncpa [#allocation3], 0  ;;  %s326_s0 = inlined_call_operand.hbm [shape: f32[2,16], index: 0, kind: input, shape index: {}]   ;;  %s327_s1 = inlined_call_operand.hbm [shape: f32[16,32], index: 1, kind: input, shape index: {}]   ;;  %s328_s2 = inlined_call_operand.vmem [shape: f32[1,32], index: 2, kind: input, shape index: {}]   ;;  %s329_s3 = inlined_call_operand.hbm [shape: f32[2,32], index: 3, kind: output, shape index: {}]  }
   0x1   :  { %9 = vsyncpa [#allocation6], 0 }
   0x2   :  { %10 = vsyncpa [#allocation4], 0 }
   0x3   :  { %15 = vsyncadd [#allocation3], 224  ;;  %s254_s12 = smov [#allocation2]   ;;  %s182_s16 = scalar_lea.hbm %s326_s0, 32 }
   0x4   :  { %s16_s13 = sshll.u32 %s254_s12, 4  ;;  %p183_p0 = scmp.ne.s32.totalorder %s326_s0, %s182_s16  ;;  %s17_s13 = int_to_ptr.vmem [resolvable:$true] %s16_s13 }
   0x5   :  { %p186_p1 = scmp.lt.u32.totalorder %s182_s16, %s326_s0 }
   0x7   :  { %p188_p2 = pnand %p186_p1, %p183_p0 }
   0x9   :  { %191 = shalt.err (!%p188_p2)
}
   0xa   :  { %s192_s21 = scalar_lea.vmem %s17_s13, 32  ;;  %s196_s22 = scalar_lea.vmem %s17_s13, 256 }
   0xb   :  { %p193_p3 = scmp.ne.s32.totalorder %s17_s13, %s192_s21  ;;  %p197_p4 = scmp.lt.s32.totalorder %s17_s13, %s17_s13 }
   0xc   :  { %p198_p5 = scmp.lt.s32.totalorder %s196_s22, %s192_s21 }
   0xe   :  { %p199_p6 = por %p198_p5, %p197_p4 }
  0x10   :  { %p200_p7 = pnand %p199_p6, %p193_p3 }
  0x12   :  { %203 = shalt.err (!%p200_p7)
}
  0x13   :  { %s255_s23 = smov 32   ;;  %s256_s24 = smov 2  }
  0x14   :  { %22 = dma.hbm_to_vmem [thread:$0]  %s326_s0, 32, %s17_s13, [#allocation3], %s255_s23, %s255_s23, %s256_s24  }
  0x15   :  { %s257_s27 = smov [#allocation5]   ;;  %s204_s4 = scalar_lea.hbm %s327_s1, 256 }
  0x16   :  { %s28_s28 = sshll.u32 %s257_s27, 4  ;;  %p205_p8 = scmp.ne.s32.totalorder %s327_s1, %s204_s4  ;;  %s29_s28 = int_to_ptr.vmem [resolvable:$true] %s28_s28 }
  0x17   :  { %p208_p9 = scmp.lt.u32.totalorder %s204_s4, %s327_s1 }
  0x19   :  { %p210_p10 = pnand %p208_p9, %p205_p8 }
  0x1b   :  { %213 = shalt.err (!%p210_p10)
}
  0x1c   :  { %s214_s9 = scalar_lea.vmem %s29_s28, 256  ;;  %p219_p12 = scmp.lt.s32.totalorder %s29_s28, %s29_s28 }
  0x1d   :  { %p215_p11 = scmp.ne.s32.totalorder %s29_s28, %s214_s9  ;;  %p220_p13 = scmp.lt.s32.totalorder %s214_s9, %s214_s9 }
  0x1f   :  { %p221_p0 = por %p220_p13, %p219_p12 }
  0x21   :  { %p222_p1 = pnand %p221_p0, %p215_p11 }
  0x23   :  { %225 = shalt.err (!%p222_p1)
}
  0x24   :  { %s258_s0 = smov 128   ;;  %s259_s10 = smov 8  }
  0x25   :  { %34 = dma.hbm_to_vmem [thread:$0]  %s327_s1, 256, %s29_s28, [#allocation6], %s258_s0, %s258_s0, %s259_s10  }
  0x26   :  { %248 = dma.done.wait [#allocation3], 256  }
  0x27   :  { %249 = vsyncadd [#allocation3], 4294967040 }
  0x28   :  { %250 = dma.done.wait [#allocation6], 256  }
  0x29   :  { %251 = vsyncadd [#allocation6], 4294967040  ;;  %vm54_vm0 = vcmask 130048   ;;  %v45_v0 = vld [vmem:[#allocation5] sm:$0xff]  ;;  %v46_v1 = vld [vmem:[#allocation5 + $0x8] sm:$0xff]  ;;  %vm136_vm1 = vcmask 261120  }
  0x2a   :  { %v43_v2 = vld [vmem:[#allocation2] sm:$0xff]  ;;  %v171_v3 = vpack.c.bf16 %v46_v1, %v45_v0  ;;  %v44_v4 = vld [vmem:[#allocation2 + $0x8] sm:$0xff] }
  0x2b   :  { %168 = vmatprep.mubr.msk.f32.mxu0 %vm54_vm0, %v43_v2  ;;  %v157_v5 = vld [vmem:[%s328_s2] ss:$0 sm:$0xff] }
  0x2c   :  { %172 = vmatprep.subr.bf16.mxu0 %v171_v3 }
  0x2d   :  { %174 = vmatpush3.bf16.msra.mxu0 %v171_v3 }
  0x30   :  { %169 = vmatmul.mubr.msk.f32.vlgmr.msra.gmra.mrb[0].mxu0 %vm54_vm0, %v44_v4 }
 0x103   :  { %v170_v6 = vpop.f32.mrb[0].mxu0 }
 0x104   :  { %v133_v7 = vadd.f32 %v170_v6, %v157_v5  ;;  %v127_v8 = vpop.f32.mrb[1].mxu0 }
 0x105   :  { %v128_v9 = vadd.f32 %v157_v5, %v127_v8 }
 0x106   :  { %138 = vst.msk [vmem:[#allocation7 + $0x8] sm:$0xff] %vm136_vm1, %v133_v7 }
 0x107   :  { %137 = vst.msk [vmem:[#allocation7] sm:$0xff] %vm136_vm1, %v128_v9 }
 0x108   :  { %143 = vsyncadd [#allocation4], 224  ;;  %s260_s1 = smov [#allocation7]  }
 0x109   :  { %s144_s15 = sshll.u32 %s260_s1, 4  ;;  %s145_s15 = int_to_ptr.vmem [resolvable:$true] %s144_s15 }
 0x10a   :  { %s226_s16 = scalar_lea.vmem %s145_s15, 32  ;;  %s230_s17 = scalar_lea.vmem %s145_s15, 256 }
 0x10b   :  { %p227_p2 = scmp.ne.s32.totalorder %s145_s15, %s226_s16  ;;  %p231_p3 = scmp.lt.s32.totalorder %s145_s15, %s145_s15 }
 0x10c   :  { %p232_p4 = scmp.lt.s32.totalorder %s230_s17, %s226_s16 }
 0x10e   :  { %p233_p5 = por %p232_p4, %p231_p3 }
 0x110   :  { %p234_p6 = pnand %p233_p5, %p227_p2 }
 0x112   :  { %237 = shalt.err (!%p234_p6)
}
 0x113   :  { %s238_s19 = scalar_lea.hbm %s329_s3, 32 }
 0x114   :  { %p239_p7 = scmp.ne.s32.totalorder %s329_s3, %s238_s19  ;;  %p242_p8 = scmp.lt.u32.totalorder %s238_s19, %s329_s3 }
 0x116   :  { %p244_p9 = pnand %p242_p8, %p239_p7 }
 0x118   :  { %247 = shalt.err (!%p244_p9)
}
 0x119   :  { %150 = dma.vmem_to_hbm [thread:$0]  %s145_s15, 32, %s329_s3, [#allocation4], %s255_s23, %s255_s23, %s256_s24  }
 0x11a   :  { %252 = dma.done.wait [#allocation4], 256  }
 0x11b   :  { %253 = vsyncadd [#allocation4], 4294967040 }
 0x11c   :  { %154 = vsyncpa [#allocation3], 1 }
 0x11d   :  { %155 = vsyncpa [#allocation6], 1 }
 0x11e   :  { %156 = vsyncpa [#allocation4], 1 }

</bundles_post_ra>
